<compile_context>
chip_gen: v6e
topology: v6e:2x2x1
jax: 0.10.0
libtpu: 0.0.40
codegen_flags: <defaults>
</compile_context>

<pallas_src>
import functools

import jax
import jax.numpy as jnp
from jax.experimental import pallas as pl
from jax.experimental.pallas import tpu as pltpu

block_size = 8                 # max sequence length T
n_emb = 32                     # embedding dim C
n_heads = 4
head_size = n_emb // n_heads   # 8


def _tpu_generation():
    """Best-effort TPU generation sniffing (5 = v5e, 6 = v6e, 7 = v7x, 0 = unknown)."""
    try:
        kind = jax.devices()[0].device_kind.lower()
    except Exception:
        return 0
    for g in (7, 6, 5, 4):
        if f"v{g}" in kind:
            return g
    return 0


def _head_kernel(x_ref, w_ref, bias_ref, o_ref, *, hs):
    # x_ref:    (N, C)       bf16 tokens of Bblk complete (padded) sequences
    # w_ref:    (C, 3*hs)    bf16 fused, pre-transposed [Wk | Wq*scale | Wv]
    # bias_ref: (N, N)       f32 additive block-diagonal causal mask (0 / -1e30)
    # o_ref:    (N, hs)      f32 output
    x = x_ref[...]
    w = w_ref[...]

    # All three projections in one bf16 MXU matmul with f32 accumulation.
    proj = jnp.dot(x, w, preferred_element_type=jnp.float32)       # (N, 3*hs)
    k = proj[:, 0 * hs:1 * hs]
    q = proj[:, 1 * hs:2 * hs]                                     # scale pre-folded
    v = proj[:, 2 * hs:3 * hs]

    # Scores for every token pair in the block; contraction over the last axis of
    # both operands lowers straight to an MXU matmul (no transpose).
    s = jnp.einsum("nh,mh->nm", q, k, preferred_element_type=jnp.float32)

    # Resident additive block-diagonal causal bias: a token may only attend to
    # earlier tokens of the SAME sequence. This reproduces per-sequence causal
    # attention exactly; masked pairs get -1e30.
    s = s + bias_ref[...]

    # Numerically-stable softmax in f32. Every row keeps its diagonal (bias 0),
    # so the row max is finite even for padded sequences -> no NaN.
    s = s - jnp.max(s, axis=-1, keepdims=True)
    p = jnp.exp(s)
    # Approximate reciprocal runs on the EUP slot (essentially free).
    p = p * pl.reciprocal(jnp.sum(p, axis=-1, keepdims=True), approx=True)

    # Weighted value sum: one (N, N) @ (N, hs) bf16 MXU pass, f32 accumulation.
    out = jnp.dot(p.astype(jnp.bfloat16), v.astype(jnp.bfloat16),
                  preferred_element_type=jnp.float32)
    # TODO(synk): the output stays hs=8 lanes wide (masked vst) because this module
    # is a single head; a lane-dense (N, n_emb) store requires fusing all n_heads,
    # which belongs to the MultiHeadAttention-level kernel (different interface).
    o_ref[...] = out.astype(o_ref.dtype)


def head_forward(x, wk, wq, wv):
    """x: (B, T, C) float32; wk/wq/wv: (head_size, n_emb). Returns (B, T, head_size)."""
    B, T, C = x.shape
    hs = wk.shape[0]

    # Fuse + pre-transpose the Linear weights once; fold the 1/sqrt(hs) score scale
    # into the Wq columns so the kernel never scales the (N, N) score matrix.
    w_fused = jnp.concatenate([wk, wq * (hs ** -0.5), wv], axis=0).T    # (C, 3*hs)
    w_fused = w_fused.astype(jnp.bfloat16)

    # Generation-aware token block: fill a 128x128 MXU push on v5e, 256x256 on
    # v6e/v7x. Blocks always contain whole sequences.
    gen = _tpu_generation()
    target_tokens = 128 if (gen and gen <= 5) else 256
    bblk = max(1, min(B, target_tokens // T))
    if gen == 7 and B >= 2:
        # v7x has 2 TensorCores per chip: make sure the "parallel" grid has >= 2 steps.
        bblk = min(bblk, -(-B // 2))

    # Pad the batch to a multiple of the batch block (whole padded sequences) and
    # slice the pad off afterwards — avoids the bblk=1 / 8-row-block fallback.
    Bp = -(-B // bblk) * bblk
    if Bp != B:
        x = jnp.pad(x, ((0, Bp - B), (0, 0), (0, 0)))

    n_tok = bblk * T
    x2d = x.reshape(Bp * T, C).astype(jnp.bfloat16)                     # token-major slab

    # Additive block-diagonal causal bias, hoisted out of the kernel: token n may
    # attend to token m iff same sequence and m <= n. 0 where allowed, -1e30 else.
    r = jnp.arange(n_tok)
    allowed = ((r[:, None] // T) == (r[None, :] // T)) & (r[None, :] <= r[:, None])
    bias = jnp.where(allowed, 0.0, -1e30).astype(jnp.float32)           # (n_tok, n_tok)

    kernel = functools.partial(_head_kernel, hs=hs)
    out2d = pl.pallas_call(
        kernel,
        out_shape=jax.ShapeDtypeStruct((Bp * T, hs), jnp.float32),
        grid_spec=pltpu.PrefetchScalarGridSpec(
            num_scalar_prefetch=0,
            grid=(Bp // bblk,),
            in_specs=[
                pl.BlockSpec((n_tok, C), lambda b: (b, 0)),        # token slab
                pl.BlockSpec((C, 3 * hs), lambda b: (0, 0)),       # fused weight (resident)
                pl.BlockSpec((n_tok, n_tok), lambda b: (0, 0)),    # additive mask (resident)
            ],
            out_specs=pl.BlockSpec((n_tok, hs), lambda b: (b, 0)),
        ),
        compiler_params=pltpu.CompilerParams(
            dimension_semantics=("parallel",),
        ),
    )(x2d, w_fused, bias)

    return out2d[:B * T].reshape(B, T, hs)


def head_reference(x, wk, wq, wv):
    """Plain-JAX f32 reference mirroring the PyTorch forward."""
    k = jnp.einsum("btc,hc->bth", x, wk)
    q = jnp.einsum("btc,hc->bth", x, wq)
    v = jnp.einsum("btc,hc->bth", x, wv)
    wei = jnp.einsum("bth,bsh->bts", q, k) * (k.shape[-1] ** -0.5)
    T = x.shape[1]
    tril = jnp.tril(jnp.ones((T, T), dtype=bool))
    wei = jnp.where(tril, wei, -jnp.inf)
    wei = jax.nn.softmax(wei, axis=-1)
    return jnp.einsum("bts,bsh->bth", wei, v)


if __name__ == "__main__":
    key = jax.random.PRNGKey(0)
    kx, kk, kq, kv = jax.random.split(key, 4)

    B, T, C = 2, block_size, n_emb
    x = jax.random.normal(kx, (B, T, C), dtype=jnp.float32)

    # Deterministic "Linear(n_emb, head_size, bias=False)" weights: (out, in)
    bound = 1.0 / (n_emb ** 0.5)
    wk = jax.random.uniform(kk, (head_size, n_emb), jnp.float32, -bound, bound)
    wq = jax.random.uniform(kq, (head_size, n_emb), jnp.float32, -bound, bound)
    wv = jax.random.uniform(kv, (head_size, n_emb), jnp.float32, -bound, bound)

    out = jax.block_until_ready(head_forward(x, wk, wq, wv))
    ref = head_reference(x, wk, wq, wv)

    assert out.shape == (B, T, head_size)
    # Tolerance covers the bf16 MXU operands (rel ~1e-2 worst case) and the EUP
    # approximate reciprocal in the softmax denominator (rel ~1e-3); the f32
    # reference is exact.
    assert jnp.allclose(out, ref, atol=2e-2, rtol=2e-2), "mismatch vs reference"

    print("KERNEL_OK")
</pallas_src>

<mosaic_0001>
module attributes {stable_mosaic.version = 11 : i64} {
  func.func @_head_kernel(%arg0: i32, %arg1: memref<16x32xbf16, #tpu.memory_space<vmem>>, %arg2: memref<32x24xbf16, #tpu.memory_space<vmem>>, %arg3: memref<16x16xf32, #tpu.memory_space<vmem>>, %arg4: memref<16x8xf32, #tpu.memory_space<vmem>>) attributes {dimension_semantics = [#tpu.dimension_semantics<parallel>], iteration_bounds = array<i64: 1>, scalar_prefetch = 0 : i64, scratch_operands = 0 : i64, tpu.core_type = #tpu.core_type<tc>, window_params = [{transform_indices = @transform_0, window_bounds = array<i64: 16, 32>}, {pipeline_mode = #tpu.pipeline_mode<synchronous>, transform_indices = @transform_1, window_bounds = array<i64: 32, 24>}, {pipeline_mode = #tpu.pipeline_mode<synchronous>, transform_indices = @transform_2, window_bounds = array<i64: 16, 16>}, {transform_indices = @transform_3, window_bounds = array<i64: 16, 8>}]} {
    %c0 = arith.constant 0 : index
    %c0_0 = arith.constant 0 : index
    %0 = vector.load %arg1[%c0, %c0_0] : memref<16x32xbf16, #tpu.memory_space<vmem>>, vector<16x32xbf16>
    %c0_1 = arith.constant 0 : index
    %c0_2 = arith.constant 0 : index
    %1 = vector.load %arg2[%c0_1, %c0_2] : memref<32x24xbf16, #tpu.memory_space<vmem>>, vector<32x24xbf16>
    %cst = arith.constant dense<0.000000e+00> : vector<16x24xf32>
    %2 = tpu.matmul %0, %1, %cst {dimension_numbers = #tpu.dot_dimension_numbers<[1], [0], [0], [1], [0, 0, 1, 1], [], []>} : vector<16x32xbf16>, vector<32x24xbf16>, vector<16x24xf32> -> vector<16x24xf32>
    %3 = vector.extract_strided_slice %2 {offsets = [0, 0], sizes = [16, 8], strides = [1, 1]} : vector<16x24xf32> to vector<16x8xf32>
    %4 = vector.extract_strided_slice %2 {offsets = [0, 8], sizes = [16, 8], strides = [1, 1]} : vector<16x24xf32> to vector<16x8xf32>
    %5 = vector.extract_strided_slice %2 {offsets = [0, 16], sizes = [16, 8], strides = [1, 1]} : vector<16x24xf32> to vector<16x8xf32>
    "tpu.trace_start"() <{level = 10 : i32, message = "nh,mh->nm"}> : () -> ()
    %cst_3 = arith.constant dense<0.000000e+00> : vector<16x16xf32>
    %6 = tpu.matmul %4, %3, %cst_3 {dimension_numbers = #tpu.dot_dimension_numbers<[1], [1], [0], [0], [0, 0, 1, 0], [], []>} : vector<16x8xf32>, vector<16x8xf32>, vector<16x16xf32> -> vector<16x16xf32>
    "tpu.trace_stop"() : () -> ()
    %c0_4 = arith.constant 0 : index
    %c0_5 = arith.constant 0 : index
    %7 = vector.load %arg3[%c0_4, %c0_5] : memref<16x16xf32, #tpu.memory_space<vmem>>, vector<16x16xf32>
    %8 = arith.addf %6, %7 : vector<16x16xf32>
    %cst_6 = arith.constant dense<0xFF800000> : vector<16xf32>
    %9 = vector.multi_reduction <maximumf>, %8, %cst_6 [1] : vector<16x16xf32> to vector<16xf32>
    %10 = vector.shape_cast %9 : vector<16xf32> to vector<16x1xf32>
    %11 = vector.broadcast %10 : vector<16x1xf32> to vector<16x16xf32>
    %12 = arith.subf %8, %11 : vector<16x16xf32>
    %13 = math.exp %12 : vector<16x16xf32>
    %cst_7 = arith.constant dense<0.000000e+00> : vector<16xf32>
    %14 = vector.multi_reduction <add>, %13, %cst_7 [1] : vector<16x16xf32> to vector<16xf32>
    %15 = vector.shape_cast %14 : vector<16xf32> to vector<16x1xf32>
    %16 = tpu.reciprocal %15 {approx = true} : vector<16x1xf32> -> vector<16x1xf32>
    %17 = vector.broadcast %16 : vector<16x1xf32> to vector<16x16xf32>
    %18 = arith.mulf %13, %17 : vector<16x16xf32>
    %19 = arith.truncf %18 : vector<16x16xf32> to vector<16x16xbf16>
    %20 = arith.truncf %5 : vector<16x8xf32> to vector<16x8xbf16>
    %cst_8 = arith.constant dense<0.000000e+00> : vector<16x8xf32>
    %21 = tpu.matmul %19, %20, %cst_8 {dimension_numbers = #tpu.dot_dimension_numbers<[1], [0], [0], [1], [0, 0, 1, 1], [], []>} : vector<16x16xbf16>, vector<16x8xbf16>, vector<16x8xf32> -> vector<16x8xf32>
    %c0_9 = arith.constant 0 : index
    %c0_10 = arith.constant 0 : index
    %22 = vector.load %arg4[%c0_9, %c0_10] : memref<16x8xf32, #tpu.memory_space<vmem>>, vector<16x8xf32>
    tpu.vector_store %arg4[%c0_9, %c0_10], %21 {strides = array<i32>} : memref<16x8xf32, #tpu.memory_space<vmem>>, vector<16x8xf32>,
    return
  }
  func.func @transform_0(%arg0: i32) -> (i32, i32) {
    %c0_i32 = arith.constant 0 : i32
    %c0_i32_0 = arith.constant 0 : i32
    return %arg0, %c0_i32 : i32, i32
  }
  func.func @transform_1(%arg0: i32) -> (i32, i32) {
    %c0_i32 = arith.constant 0 : i32
    %c0_i32_0 = arith.constant 0 : i32
    %c0_i32_1 = arith.constant 0 : i32
    return %c0_i32, %c0_i32_0 : i32, i32
  }
  func.func @transform_2(%arg0: i32) -> (i32, i32) {
    %c0_i32 = arith.constant 0 : i32
    %c0_i32_0 = arith.constant 0 : i32
    %c0_i32_1 = arith.constant 0 : i32
    return %c0_i32, %c0_i32_0 : i32, i32
  }
  func.func @transform_3(%arg0: i32) -> (i32, i32) {
    %c0_i32 = arith.constant 0 : i32
    %c0_i32_0 = arith.constant 0 : i32
    return %arg0, %c0_i32 : i32, i32
  }
}

</mosaic_0001>

<bundles_post_ra>
// kernel: tpu_custom_call.1
= control target key start
LH: loop header
LB: loop body
LE: loop exit
PB: predicated region body
PF: predicated region fallthrough
CT: control target
= control target key end

     0   :  { %v308_v0 = vmov 0.0   ;;  %vm309_vm0 = vmmov 0   ;;  %vm38_vm1 = vcmask 261120   ;;  %s310_s18 = smov 120   ;;  %vm91_vm2 = vcmask 64512   ;;  %s368_s1 = inlined_call_operand.vmem [shape: bf16[32,24], index: 1, kind: input, shape index: {}]   ;;  %s369_s0 = inlined_call_operand.vmem [shape: bf16[16,32], index: 0, kind: input, shape index: {}]   ;;  %s370_s2 = inlined_call_operand.vmem [shape: f32[16,16], index: 2, kind: input, shape index: {}]   ;;  %s371_s3 = inlined_call_operand.vmem [shape: f32[16,8], index: 3, kind: output, shape index: {}]  }
   0x1   :  { %272 = vmatprep.subr.bf16.mxu0 %v308_v0  ;;  %v297_v1 = vld [vmem:[%s368_s1 + $0x8] sm:$0xff]   ;;  %276 = vmatprep.mubr.msk.bf16.mxu0 %vm309_vm0, %v308_v0  ;;  %v298_v2 = vld [vmem:[%s368_s1] sm:$0xff]   ;;  %vm175_vm3 = vcmask 130048  }
   0x2   :  { %273 = vmatpush3.bf16.msra.mxu0 %v297_v1  ;;  %v299_v3 = vld [vmem:[%s369_s0] sm:$0xff]   ;;  %v84_v13 = vld [vmem:[%s370_s2 + $0x8] sm:$0xff] }
   0x3   :  { %274 = vmatprep.subr.bf16.mxu0 %v308_v0  ;;  %v83_v12 = vld [vmem:[%s370_s2] sm:$0xff]  ;;  %s311_s2 = smov 112  }
   0x6   :  { %275 = vmatpush3.bf16.msra.mxu0 %v298_v2 }
   0x9   :  { %277 = vmatmul.mubr.msk.bf16.vlgmr.msra.gmra.mxu0 %vm38_vm1, %v299_v3 }
  0xc9   :  { %v76_v4 = vpop.f32.mrf.mxu0 }
  0xca   :  { %87 = vrot.lane.b32.xlu0 %v76_v4, %s310_s18 }
  0xcb   :  { %v278_v5 = vpop.f32.mrf.mxu0 }
  0xcd   :  { %v79_v6 = vpop.f32.mrf.mxu0 }
  0xce   :  { %89 = vrot.lane.b32.xlu0 %v79_v6, %s310_s18  ;;  %280 = vmatprep.subr.msk.mxu1 %vm91_vm2, %v79_v6  ;;  %v199_v7 = vpack.c.bf16 %v79_v6, %v76_v4 }
  0xcf   :  { %v279_v8 = vpop.f32.mrf.mxu0  ;;  %281 = vmatpush3.xpose.msk.msra.mxu1 %vm91_vm2, %v79_v6 }
  0xd0   :  { %282 = vmatprep.subr.msk.mxu1 %vm91_vm2, %v76_v4 }
  0xd3   :  { %283 = vmatpush3.xpose.msk.msra.mxu1 %vm91_vm2, %v76_v4 }
  0xd4   :  { %287 = vmatprep.subr.bf16.mxu1 %v308_v0 }
 0x13c   :  { %v88_v9 = vpop.permute.xlu0 %87 }
 0x13d   :  { %284 = vmatprep.mubr.msk.f32.mxu1 %vm91_vm2, %v88_v9 }
 0x140   :  { %v90_v10 = vpop.permute.xlu0 %89 }
 0x141   :  { %285 = vmatmul.mubr.msk.f32.vlgmr.msra.gmra.mxu1 %vm91_vm2, %v90_v10 }
 0x142   :  { %289 = vmatprep.mubr.msk.bf16.mxu1 %vm309_vm0, %v308_v0 }
 0x201   :  { %v286_v11 = vpop.f32.mrf.mxu1 }
 0x202   :  { %v172_v16 = vadd.f32 %v286_v11, %v84_v13 }
 0x203   :  { %v166_v14 = vpop.f32.mrf.mxu1 }
 0x204   :  { %v167_v15 = vadd.f32 %v166_v14, %v83_v12  ;;  %v179_v18 = vsel %vm175_vm3, %v172_v16, -inf }
 0x206   :  { %v176_v17 = vsel %vm175_vm3, %v167_v15, -inf }
 0x207   :  { %177 = vmax.xlane.f32.xlu1 %v176_v17 }
 0x20b   :  { %180 = vmax.xlane.f32.xlu1 %v179_v18 }
 0x290   :  { %v178_v19 = vpop.xlane.xlu1 %177 }
 0x291   :  { %v182_v20 = vsub.f32 %v167_v15, %v178_v19 }
 0x293   :  { %v184_v21 = vmul.f32 1.442695, %v182_v20 }
 0x294   :  { %v181_v22 = vpop.xlane.xlu1 %180 }
 0x295   :  { %300 = vpow2.f32 %v184_v21  ;;  %v183_v23 = vsub.f32 %v172_v16, %v181_v22 }
 0x297   :  { %v186_v24 = vmul.f32 1.442695, %v183_v23 }
 0x299   :  { %302 = vpow2.f32 %v186_v24 }
 0x2a2   :  { %v301_v25 = vpop.eup %300 }
 0x2a3   :  { %v188_v26 = vsel %vm175_vm3, %v301_v25, 0.0 }
 0x2a4   :  { %189 = vadd.xlane.f32.xlu0 %v188_v26 }
 0x2a6   :  { %v303_v27 = vpop.eup %302 }
 0x2a7   :  { %v191_v28 = vsel %vm175_vm3, %v303_v27, 0.0 }
 0x2a8   :  { %192 = vadd.xlane.f32.xlu1 %v191_v28 }
 0x2b9   :  { %201 = vrot.lane.b32.xlu1 %v199_v7, %s311_s2 }
 0x32d   :  { %v190_v29 = vpop.xlane.xlu0 %189 }
 0x32e   :  { %304 = vrcp.f32 %v190_v29 }
 0x331   :  { %v193_v30 = vpop.xlane.xlu1 %192 }
 0x332   :  { %306 = vrcp.f32 %v193_v30 }
 0x335   :  { %v202_v31 = vpop.permute.xlu1 %201 }
 0x336   :  { %288 = vmatpush3.bf16.msra.mxu1 %v202_v31 }
 0x33b   :  { %v305_v32 = vpop.eup %304 }
 0x33c   :  { %v196_v34 = vmul.f32 %v305_v32, %v301_v25 }
 0x33f   :  { %v307_v33 = vpop.eup %306 }
 0x340   :  { %v197_v35 = vmul.f32 %v307_v33, %v303_v27 }
 0x342   :  { %v198_v36 = vpack.c.bf16 %v197_v35, %v196_v34 }
 0x344   :  { %290 = vmatmul.mubr.msk.bf16.vlgmr.msra.gmra.mxu1 %vm175_vm3, %v198_v36 }
 0x404   :  { %v241_v37 = vpop.f32.mrf.mxu1 }
 0x405   :  { %248 = vst.msk [vmem:[%s371_s3] sm:$0xff] %vm91_vm2, %v241_v37 }
 0x406   :  { %v291_v38 = vpop.f32.mrf.mxu1 }
 0x408   :  { %v244_v39 = vpop.f32.mrf.mxu1 }
 0x409   :  { %249 = vst.msk [vmem:[%s371_s3 + $0x8] sm:$0xff] %vm91_vm2, %v244_v39 }
 0x40a   :  { %v292_v40 = vpop.f32.mrf.mxu1 }

</bundles_post_ra>
